<compile_context>
chip_gen: v7x
topology: tpu7x:2x2x1
jax: 0.10.0
libtpu: 0.0.40
codegen_flags: <defaults>
</compile_context>

<pallas_src>
import math

import jax
import jax.numpy as jnp
from jax import lax
from jax.experimental import pallas as pl
from jax.experimental.pallas import tpu as pltpu

# ---- problem sizes (small, consistent with the module's forward) ------------
N = 8                      # tokens per sequence (rows of x)
DIM_IN = 32                # dim_in == dim_k == dim_v
NUM_HEADS = 4
DK = DIM_IN // NUM_HEADS   # per-head key dim
DV = DIM_IN // NUM_HEADS   # per-head value dim
NORM_FACT = 1.0 / math.sqrt(DK)

_CONTRACT_LAST = (((1,), (1,)), ((), ()))   # contract last dim of both operands


def mhsa_kernel(x_ref, wqkv_ref, o_ref):
    """Multi-head self-attention for one (N, DIM_IN) sequence held in VMEM.

    x_ref:    (1, N, DIM_IN)        current batch element
    wqkv_ref: (3*DIM_IN, DIM_IN)    rows = [wq * NORM_FACT ; wk ; wv] (nn.Linear layout)
    o_ref:    (1, N, DIM_IN)
    """
    x = x_ref[0]            # (N, DIM_IN)
    wqkv = wqkv_ref[...]    # (3*DIM_IN, DIM_IN)

    # --- fused Q/K/V projection: one (N,32)@(32,96) MXU matmul ---------------
    # qkv = x @ wqkv.T  -> (N, 3*DIM_IN); NORM_FACT already folded into wq rows.
    qkv = lax.dot_general(x, wqkv, _CONTRACT_LAST,
                          preferred_element_type=jnp.float32)
    q = qkv[:, 0:DIM_IN]                 # (N, DIM_IN), pre-scaled by NORM_FACT
    k = qkv[:, DIM_IN:2 * DIM_IN]        # (N, DIM_IN)
    v = qkv[:, 2 * DIM_IN:3 * DIM_IN]    # (N, DIM_IN)

    # --- per-head scores, stacked along sublanes for a single softmax pass ---
    s_list = []
    for h in range(NUM_HEADS):
        q_h = q[:, h * DK:(h + 1) * DK]  # (N, DK)
        k_h = k[:, h * DK:(h + 1) * DK]  # (N, DK)
        # q_h @ k_h.T -> (N, N); scale already baked into q.
        s_list.append(lax.dot_general(q_h, k_h, _CONTRACT_LAST,
                                      preferred_element_type=jnp.float32))
    s = jnp.concatenate(s_list, axis=0)  # (NUM_HEADS*N, N)

    # numerically-stable softmax over the last axis, one reduce for all heads
    s = s - jnp.max(s, axis=-1, keepdims=True)
    p = jnp.exp(s)
    denom = jnp.sum(p, axis=-1, keepdims=True)
    p = p * pl.reciprocal(denom, approx=True)        # EUP vrcp, not a VPU divide

    # --- per-head attention output, merged into one lane-dense store ---------
    att_list = []
    for h in range(NUM_HEADS):
        p_h = p[h * N:(h + 1) * N, :]            # (N, N)
        v_h = v[:, h * DV:(h + 1) * DV]          # (N, DV)
        att_list.append(jnp.dot(p_h, v_h, preferred_element_type=jnp.float32))
    o_ref[0] = jnp.concatenate(att_list, axis=-1)    # single (N, DIM_IN) store


def multi_head_self_attention_batched(xb, wq, wk, wv):
    """Batched forward: xb is (B, N, DIM_IN); weights are shared across batch.

    One pallas_call processes the whole batch with a grid over B marked
    "parallel" (amortizes per-invocation overhead; enables the second
    TensorCore on v7x).
    """
    B = xb.shape[0]
    assert xb.shape[1:] == (N, DIM_IN)

    # Fold NORM_FACT into the Q weight and fuse the three projections into one
    # weight slab (done once at trace time, outside the kernel).
    wqkv = jnp.concatenate(
        [wq.astype(jnp.float32) * NORM_FACT,
         wk.astype(jnp.float32),
         wv.astype(jnp.float32)], axis=0)            # (3*DIM_IN, DIM_IN)

    return pl.pallas_call(
        mhsa_kernel,
        out_shape=jax.ShapeDtypeStruct((B, N, DIM_IN), jnp.float32),
        grid_spec=pltpu.PrefetchScalarGridSpec(
            num_scalar_prefetch=0,
            grid=(B,),
            in_specs=[
                pl.BlockSpec((1, N, DIM_IN), lambda b: (b, 0, 0)),
                pl.BlockSpec((3 * DIM_IN, DIM_IN), lambda b: (0, 0)),
            ],
            out_specs=pl.BlockSpec((1, N, DIM_IN), lambda b: (b, 0, 0)),
        ),
        compiler_params=pltpu.CompilerParams(
            dimension_semantics=("parallel",)),
    )(xb, wqkv)


def multi_head_self_attention(x, wq, wk, wv, rela=None):
    """Mirrors MultiHeadSelfAttention.forward(x, rela) for a single sequence.

    `rela` is accepted for signature parity but (as in the PyTorch forward)
    is unused.
    """
    n, dim_in = x.shape
    assert n == N and dim_in == DIM_IN
    out = multi_head_self_attention_batched(x[None], wq, wk, wv)
    return out[0]


def _reference(x, wq, wk, wv):
    """Plain-JAX reference replicating the PyTorch forward exactly."""
    n = x.shape[0]
    q = (x @ wq.T).reshape(n, NUM_HEADS, DK).transpose(1, 0, 2)
    k = (x @ wk.T).reshape(n, NUM_HEADS, DK).transpose(1, 0, 2)
    v = (x @ wv.T).reshape(n, NUM_HEADS, DV).transpose(1, 0, 2)
    dist = jnp.einsum("hnd,hmd->hnm", q, k) * NORM_FACT
    dist = jax.nn.softmax(dist, axis=-1)
    att = jnp.einsum("hnm,hmd->hnd", dist, v)
    return att.transpose(1, 0, 2).reshape(n, DIM_IN)


if __name__ == "__main__":
    key = jax.random.PRNGKey(0)
    kx, kq, kk, kv, kr = jax.random.split(key, 5)

    # deterministic synthetic parameters (nn.Linear weight shape: (out, in))
    bound = 1.0 / math.sqrt(DIM_IN)
    x = jax.random.normal(kx, (N, DIM_IN), dtype=jnp.float32)
    wq = jax.random.uniform(kq, (DIM_IN, DIM_IN), jnp.float32, -bound, bound)
    wk = jax.random.uniform(kk, (DIM_IN, DIM_IN), jnp.float32, -bound, bound)
    wv = jax.random.uniform(kv, (DIM_IN, DIM_IN), jnp.float32, -bound, bound)
    rela = jax.random.normal(kr, (N, N), dtype=jnp.float32)   # unused by forward

    # ---- single-sequence forward (module semantics) -------------------------
    out = multi_head_self_attention(x, wq, wk, wv, rela)
    out = jax.block_until_ready(out)
    ref = _reference(x, wq, wk, wv)
    assert out.shape == (N, DIM_IN)
    # tolerance widened slightly because softmax uses the EUP approx reciprocal
    assert jnp.allclose(out, ref, atol=2e-3, rtol=2e-3), "mismatch vs reference"

    # ---- batched forward (amortizes per-call overhead; parallel grid) -------
    B = 4
    xb = jax.random.normal(jax.random.PRNGKey(1), (B, N, DIM_IN), jnp.float32)
    outb = jax.block_until_ready(multi_head_self_attention_batched(xb, wq, wk, wv))
    refb = jnp.stack([_reference(xb[b], wq, wk, wv) for b in range(B)])
    assert outb.shape == (B, N, DIM_IN)
    assert jnp.allclose(outb, refb, atol=2e-3, rtol=2e-3), "batched mismatch"

    print("KERNEL_OK")
</pallas_src>

<mosaic_0001>
module attributes {stable_mosaic.version = 11 : i64} {
  func.func @mhsa_kernel(%arg0: i32, %arg1: memref<1x8x32xf32, #tpu.memory_space<vmem>>, %arg2: memref<96x32xf32, #tpu.memory_space<vmem>>, %arg3: memref<1x8x32xf32, #tpu.memory_space<vmem>>) attributes {dimension_semantics = [#tpu.dimension_semantics<parallel>], iteration_bounds = array<i64: 1>, scalar_prefetch = 0 : i64, scratch_operands = 0 : i64, tpu.core_type = #tpu.core_type<tc>, window_params = [{transform_indices = @transform_0, window_bounds = array<i64: 1, 8, 32>}, {pipeline_mode = #tpu.pipeline_mode<synchronous>, transform_indices = @transform_1, window_bounds = array<i64: 96, 32>}, {transform_indices = @transform_2, window_bounds = array<i64: 1, 8, 32>}]} {
    %c0 = arith.constant 0 : index
    %c0_0 = arith.constant 0 : index
    %c0_1 = arith.constant 0 : index
    %0 = vector.load %arg1[%c0, %c0_0, %c0_1] : memref<1x8x32xf32, #tpu.memory_space<vmem>>, vector<1x8x32xf32>
    %1 = vector.shape_cast %0 : vector<1x8x32xf32> to vector<8x32xf32>
    %c0_2 = arith.constant 0 : index
    %c0_3 = arith.constant 0 : index
    %2 = vector.load %arg2[%c0_2, %c0_3] : memref<96x32xf32, #tpu.memory_space<vmem>>, vector<96x32xf32>
    %cst = arith.constant dense<0.000000e+00> : vector<8x96xf32>
    %3 = tpu.matmul %1, %2, %cst {dimension_numbers = #tpu.dot_dimension_numbers<[1], [1], [0], [0], [0, 0, 1, 0], [], []>} : vector<8x32xf32>, vector<96x32xf32>, vector<8x96xf32> -> vector<8x96xf32>
    %4 = vector.extract_strided_slice %3 {offsets = [0, 0], sizes = [8, 32], strides = [1, 1]} : vector<8x96xf32> to vector<8x32xf32>
    %5 = vector.extract_strided_slice %3 {offsets = [0, 32], sizes = [8, 32], strides = [1, 1]} : vector<8x96xf32> to vector<8x32xf32>
    %6 = vector.extract_strided_slice %3 {offsets = [0, 64], sizes = [8, 32], strides = [1, 1]} : vector<8x96xf32> to vector<8x32xf32>
    %7 = vector.extract_strided_slice %4 {offsets = [0, 0], sizes = [8, 8], strides = [1, 1]} : vector<8x32xf32> to vector<8x8xf32>
    %8 = vector.extract_strided_slice %5 {offsets = [0, 0], sizes = [8, 8], strides = [1, 1]} : vector<8x32xf32> to vector<8x8xf32>
    %cst_4 = arith.constant dense<0.000000e+00> : vector<8x8xf32>
    %9 = tpu.matmul %7, %8, %cst_4 {dimension_numbers = #tpu.dot_dimension_numbers<[1], [1], [0], [0], [0, 0, 1, 0], [], []>} : vector<8x8xf32>, vector<8x8xf32>, vector<8x8xf32> -> vector<8x8xf32>
    %10 = vector.extract_strided_slice %4 {offsets = [0, 8], sizes = [8, 8], strides = [1, 1]} : vector<8x32xf32> to vector<8x8xf32>
    %11 = vector.extract_strided_slice %5 {offsets = [0, 8], sizes = [8, 8], strides = [1, 1]} : vector<8x32xf32> to vector<8x8xf32>
    %cst_5 = arith.constant dense<0.000000e+00> : vector<8x8xf32>
    %12 = tpu.matmul %10, %11, %cst_5 {dimension_numbers = #tpu.dot_dimension_numbers<[1], [1], [0], [0], [0, 0, 1, 0], [], []>} : vector<8x8xf32>, vector<8x8xf32>, vector<8x8xf32> -> vector<8x8xf32>
    %13 = vector.extract_strided_slice %4 {offsets = [0, 16], sizes = [8, 8], strides = [1, 1]} : vector<8x32xf32> to vector<8x8xf32>
    %14 = vector.extract_strided_slice %5 {offsets = [0, 16], sizes = [8, 8], strides = [1, 1]} : vector<8x32xf32> to vector<8x8xf32>
    %cst_6 = arith.constant dense<0.000000e+00> : vector<8x8xf32>
    %15 = tpu.matmul %13, %14, %cst_6 {dimension_numbers = #tpu.dot_dimension_numbers<[1], [1], [0], [0], [0, 0, 1, 0], [], []>} : vector<8x8xf32>, vector<8x8xf32>, vector<8x8xf32> -> vector<8x8xf32>
    %16 = vector.extract_strided_slice %4 {offsets = [0, 24], sizes = [8, 8], strides = [1, 1]} : vector<8x32xf32> to vector<8x8xf32>
    %17 = vector.extract_strided_slice %5 {offsets = [0, 24], sizes = [8, 8], strides = [1, 1]} : vector<8x32xf32> to vector<8x8xf32>
    %cst_7 = arith.constant dense<0.000000e+00> : vector<8x8xf32>
    %18 = tpu.matmul %16, %17, %cst_7 {dimension_numbers = #tpu.dot_dimension_numbers<[1], [1], [0], [0], [0, 0, 1, 0], [], []>} : vector<8x8xf32>, vector<8x8xf32>, vector<8x8xf32> -> vector<8x8xf32>
    %19 = tpu.concatenate %9, %12, %15, %18 in 0 : vector<8x8xf32>, vector<8x8xf32>, vector<8x8xf32>, vector<8x8xf32> -> vector<32x8xf32>
    %cst_8 = arith.constant dense<0xFF800000> : vector<32xf32>
    %20 = vector.multi_reduction <maximumf>, %19, %cst_8 [1] : vector<32x8xf32> to vector<32xf32>
    %21 = vector.shape_cast %20 : vector<32xf32> to vector<32x1xf32>
    %22 = vector.broadcast %21 : vector<32x1xf32> to vector<32x8xf32>
    %23 = arith.subf %19, %22 : vector<32x8xf32>
    %24 = math.exp %23 : vector<32x8xf32>
    %cst_9 = arith.constant dense<0.000000e+00> : vector<32xf32>
    %25 = vector.multi_reduction <add>, %24, %cst_9 [1] : vector<32x8xf32> to vector<32xf32>
    %26 = vector.shape_cast %25 : vector<32xf32> to vector<32x1xf32>
    %27 = tpu.reciprocal %26 {approx = true} : vector<32x1xf32> -> vector<32x1xf32>
    %28 = vector.broadcast %27 : vector<32x1xf32> to vector<32x8xf32>
    %29 = arith.mulf %24, %28 : vector<32x8xf32>
    %30 = vector.extract_strided_slice %29 {offsets = [0, 0], sizes = [8, 8], strides = [1, 1]} : vector<32x8xf32> to vector<8x8xf32>
    %31 = vector.extract_strided_slice %6 {offsets = [0, 0], sizes = [8, 8], strides = [1, 1]} : vector<8x32xf32> to vector<8x8xf32>
    %cst_10 = arith.constant dense<0.000000e+00> : vector<8x8xf32>
    %32 = tpu.matmul %30, %31, %cst_10 {dimension_numbers = #tpu.dot_dimension_numbers<[1], [0], [0], [1], [0, 0, 1, 1], [], []>} : vector<8x8xf32>, vector<8x8xf32>, vector<8x8xf32> -> vector<8x8xf32>
    %33 = vector.extract_strided_slice %29 {offsets = [8, 0], sizes = [8, 8], strides = [1, 1]} : vector<32x8xf32> to vector<8x8xf32>
    %34 = vector.extract_strided_slice %6 {offsets = [0, 8], sizes = [8, 8], strides = [1, 1]} : vector<8x32xf32> to vector<8x8xf32>
    %cst_11 = arith.constant dense<0.000000e+00> : vector<8x8xf32>
    %35 = tpu.matmul %33, %34, %cst_11 {dimension_numbers = #tpu.dot_dimension_numbers<[1], [0], [0], [1], [0, 0, 1, 1], [], []>} : vector<8x8xf32>, vector<8x8xf32>, vector<8x8xf32> -> vector<8x8xf32>
    %36 = vector.extract_strided_slice %29 {offsets = [16, 0], sizes = [8, 8], strides = [1, 1]} : vector<32x8xf32> to vector<8x8xf32>
    %37 = vector.extract_strided_slice %6 {offsets = [0, 16], sizes = [8, 8], strides = [1, 1]} : vector<8x32xf32> to vector<8x8xf32>
    %cst_12 = arith.constant dense<0.000000e+00> : vector<8x8xf32>
    %38 = tpu.matmul %36, %37, %cst_12 {dimension_numbers = #tpu.dot_dimension_numbers<[1], [0], [0], [1], [0, 0, 1, 1], [], []>} : vector<8x8xf32>, vector<8x8xf32>, vector<8x8xf32> -> vector<8x8xf32>
    %39 = vector.extract_strided_slice %29 {offsets = [24, 0], sizes = [8, 8], strides = [1, 1]} : vector<32x8xf32> to vector<8x8xf32>
    %40 = vector.extract_strided_slice %6 {offsets = [0, 24], sizes = [8, 8], strides = [1, 1]} : vector<8x32xf32> to vector<8x8xf32>
    %cst_13 = arith.constant dense<0.000000e+00> : vector<8x8xf32>
    %41 = tpu.matmul %39, %40, %cst_13 {dimension_numbers = #tpu.dot_dimension_numbers<[1], [0], [0], [1], [0, 0, 1, 1], [], []>} : vector<8x8xf32>, vector<8x8xf32>, vector<8x8xf32> -> vector<8x8xf32>
    %42 = tpu.concatenate %32, %35, %38, %41 in 1 : vector<8x8xf32>, vector<8x8xf32>, vector<8x8xf32>, vector<8x8xf32> -> vector<8x32xf32>
    %c0_14 = arith.constant 0 : index
    %c0_15 = arith.constant 0 : index
    %c0_16 = arith.constant 0 : index
    %43 = vector.load %arg3[%c0_14, %c0_15, %c0_16] : memref<1x8x32xf32, #tpu.memory_space<vmem>>, vector<1x8x32xf32>
    %44 = vector.shape_cast %43 : vector<1x8x32xf32> to vector<8x32xf32>
    %45 = vector.shape_cast %42 : vector<8x32xf32> to vector<1x8x32xf32>
    tpu.vector_store %arg3[%c0_14, %c0_15, %c0_16], %45 {strides = array<i32>} : memref<1x8x32xf32, #tpu.memory_space<vmem>>, vector<1x8x32xf32>,
    return
  }
  func.func @transform_0(%arg0: i32) -> (i32, i32, i32) {
    %c0_i32 = arith.constant 0 : i32
    %c0_i32_0 = arith.constant 0 : i32
    %c0_i32_1 = arith.constant 0 : i32
    return %arg0, %c0_i32, %c0_i32_0 : i32, i32, i32
  }
  func.func @transform_1(%arg0: i32) -> (i32, i32) {
    %c0_i32 = arith.constant 0 : i32
    %c0_i32_0 = arith.constant 0 : i32
    %c0_i32_1 = arith.constant 0 : i32
    return %c0_i32, %c0_i32_0 : i32, i32
  }
  func.func @transform_2(%arg0: i32) -> (i32, i32, i32) {
    %c0_i32 = arith.constant 0 : i32
    %c0_i32_0 = arith.constant 0 : i32
    %c0_i32_1 = arith.constant 0 : i32
    return %arg0, %c0_i32, %c0_i32_0 : i32, i32, i32
  }
}

</mosaic_0001>

<bundles_post_ra>
// kernel: tpu_custom_call.1
= control target key start
LH: loop header
LB: loop body
LE: loop exit
PB: predicated region body
PF: predicated region fallthrough
CT: control target
= control target key end

     0   :  { %vm25_vm0 = vcmask 261120   ;;  %v1030_v2 = vmov 0.0|0.0   ;;  %vm1031_vm2 = vmmov 0   ;;  %v1032_v5 = vmov 0.0   ;;  %s1195_s0 = inlined_call_operand.vmem [shape: f32[1,8,32], index: 0, kind: input, shape index: {}]   ;;  %s1196_s1 = inlined_call_operand.vmem [shape: f32[96,32], index: 1, kind: input, shape index: {}]   ;;  %s1197_s2 = inlined_call_operand.hbm [shape: f32[1,8,32], index: 2, kind: output, shape index: {}]  }
   0x1   :  { %v13_v0 = vld [vmem:[%s1196_s1] sm:$0xff]  ;;  %v14_v1 = vld [vmem:[%s1196_s1 + $0x8] sm:$0xff]  ;;  %948 = vmatprep.subr.bf16.mxu0 %v1030_v2  ;;  %vm1071_vm1 = vmpackc.low %vm25_vm0, %vm25_vm0  ;;  %905 = vmatprep.mubr.msk.f32.mxu0 %vm1031_vm2, %v1032_v5 }
   0x2   :  { %v949_v3 = vpack.c.bf16 %v14_v1, %v13_v0  ;;  %908 = vmatprep.subr.mxu1 %v1032_v5  ;;  %910 = vmatprep.mubr.msk.f32.mxu1 %vm1031_vm2, %v1032_v5  ;;  %v15_v6 = vld [vmem:[%s1196_s1 + $0x10] sm:$0xff]  ;;  %v16_v7 = vld [vmem:[%s1196_s1 + $0x18] sm:$0xff] }
   0x4   :  { %951 = vmatpush3.bf16.xpose.msk.msra.mxu0 %vm1071_vm1, %v949_v3 }
   0x5   :  { %952 = vmatprep.subr.bf16.mxu0 %v1030_v2 }
   0x6   :  { %7 = vsyncpa [#allocation3], 0  ;;  %v953_v8 = vpack.c.bf16 %v16_v7, %v15_v6  ;;  %v17_v9 = vld [vmem:[%s1196_s1 + $0x20] sm:$0xff]  ;;  %v18_v10 = vld [vmem:[%s1196_s1 + $0x28] sm:$0xff]  ;;  %s1033_s7 = smov 120   ;;  %s1034_s8 = smov 96  }
   0x7   :  { %v957_v11 = vpack.c.bf16 %v18_v10, %v17_v9  ;;  %v19_v12 = vld [vmem:[%s1196_s1 + $0x30] sm:$0xff]  ;;  %v20_v13 = vld [vmem:[%s1196_s1 + $0x38] sm:$0xff]  ;;  %v21_v15 = vld [vmem:[%s1196_s1 + $0x40] sm:$0xff]  ;;  %s1036_s9 = smov 88   ;;  %s1037_s10 = smov 72   ;;  %vm138_vm3 = vcmask 64512  }
   0x8   :  { %v961_v14 = vpack.c.bf16 %v20_v13, %v19_v12  ;;  %v22_v16 = vld [vmem:[%s1196_s1 + $0x48] sm:$0xff]  ;;  %v23_v18 = vld [vmem:[%s1196_s1 + $0x50] sm:$0xff]  ;;  %v24_v19 = vld [vmem:[%s1196_s1 + $0x58] sm:$0xff]  ;;  %s1035_s1 = smov 80   ;;  %s1039_s11 = smov 104   ;;  %vm808_vm4 = vcmask 130048  }
   0x9   :  { %v965_v17 = vpack.c.bf16 %v22_v16, %v21_v15  ;;  %v969_v20 = vpack.c.bf16 %v24_v19, %v23_v18  ;;  %v12_v21 = vld [vmem:[%s1195_s0] sm:$0xff]  ;;  %s1038_s0 = smov 112   ;;  %s1040_s12 = smov 56   ;;  %vm810_vm5 = vcmask 195584  }
   0xa   :  { %s1041_s13 = smov 64   ;;  %s1042_s14 = smov 48  }
   0xb   :  { %s1043_s15 = smov 40   ;;  %s1044_s16 = smov 8  }
   0xc   :  { %955 = vmatpush3.bf16.xpose.msk.msra.mxu0 %vm1071_vm1, %v953_v8  ;;  %s1045_s17 = smov 16   ;;  %s1046_s18 = smov 24  }
   0xd   :  { %956 = vmatprep.subr.bf16.mxu0 %v1030_v2  ;;  %s1047_s19 = smov [#allocation2]  }
   0xe   :  { %s819_s20 = sshll.u32 %s1047_s19, 4  ;;  %s820_s20 = int_to_ptr.vmem [resolvable:$true] %s819_s20 }
   0xf   :  { %s1006_s21 = scalar_lea.vmem %s820_s20, 128  ;;  %p1011_p1 = scmp.lt.s32.totalorder %s820_s20, %s820_s20 }
  0x10   :  { %p1007_p0 = scmp.ne.s32.totalorder %s820_s20, %s1006_s21  ;;  %p1012_p2 = scmp.lt.s32.totalorder %s1006_s21, %s1006_s21 }
  0x12   :  { %p1013_p3 = por %p1012_p2, %p1011_p1 }
  0x14   :  { %959 = vmatpush3.bf16.xpose.msk.msra.mxu0 %vm1071_vm1, %v957_v11  ;;  %p1014_p4 = pnand %p1013_p3, %p1007_p0 }
  0x15   :  { %960 = vmatprep.subr.bf16.mxu0 %v1030_v2 }
  0x1c   :  { %963 = vmatpush3.bf16.xpose.msk.msra.mxu0 %vm1071_vm1, %v961_v14 }
  0x1d   :  { %964 = vmatprep.subr.bf16.mxu0 %v1030_v2 }
  0x24   :  { %967 = vmatpush3.bf16.xpose.msk.msra.mxu0 %vm1071_vm1, %v965_v17 }
  0x25   :  { %968 = vmatprep.subr.bf16.mxu0 %v1030_v2 }
  0x2c   :  { %971 = vmatpush3.bf16.xpose.msk.msra.mxu0 %vm1071_vm1, %v969_v20 }
  0x33   :  { %906 = vmatmul.mubr.msk.f32.vlgmr.msra.gmra.mrb[0].mxu0 %vm25_vm0, %v12_v21 }
 0x106   :  { %v1126_v22 = vpop.f32.mrb[0].mxu0 }
 0x107   :  { %213 = vrot.lane.b32.xlu1 %v1126_v22, %s1033_s7  ;;  %136 = vrot.lane.b32.xlu0 %v1126_v22, %s1034_s8  ;;  %v907_v23 = vpop.f32.mrb[1].mxu0 }
 0x10b   :  { %293 = vrot.lane.b32.xlu1 %v1126_v22, %s1035_s1  ;;  %215 = vrot.lane.b32.xlu0 %v1126_v22, %s1036_s9 }
 0x10f   :  { %371 = vrot.lane.b32.xlu1 %v1126_v22, %s1037_s10  ;;  %291 = vrot.lane.b32.xlu0 %v1126_v22, %s1038_s0 }
 0x113   :  { %369 = vrot.lane.b32.xlu0 %v1126_v22, %s1039_s11 }
 0x179   :  { %v214_v24 = vpop.permute.xlu1 %213  ;;  %v137_v25 = vpop.permute.xlu0 %136 }
 0x17a   :  { %909 = vmatpush3.xpose.msk.msra.mxu1 %vm138_vm3, %v137_v25 }
 0x17b   :  { %913 = vmatprep.subr.mxu1 %v1032_v5 }
 0x17d   :  { %911 = vmatmul.mubr.msk.f32.vlgmr.msra.gmra.mrb[0].mxu1 %vm138_vm3, %v1126_v22  ;;  %v216_v26 = vpop.permute.xlu0 %215  ;;  %v294_v27 = vpop.permute.xlu1 %293 }
 0x17e   :  { %914 = vmatpush3.xpose.msk.msra.mxu1 %vm138_vm3, %v216_v26  ;;  %915 = vmatprep.mubr.msk.f32.mxu1 %vm1031_vm2, %v1032_v5 }
 0x17f   :  { %918 = vmatprep.subr.mxu1 %v1032_v5 }
 0x181   :  { %916 = vmatmul.mubr.msk.f32.vlgmr.msra.gmra.mrb[2].mxu1 %vm138_vm3, %v214_v24  ;;  %v292_v28 = vpop.permute.xlu0 %291  ;;  %v372_v29 = vpop.permute.xlu1 %371 }
 0x182   :  { %919 = vmatpush3.xpose.msk.msra.mxu1 %vm138_vm3, %v294_v27  ;;  %920 = vmatprep.mubr.msk.f32.mxu1 %vm1031_vm2, %v1032_v5 }
 0x183   :  { %923 = vmatprep.subr.mxu1 %v1032_v5 }
 0x185   :  { %921 = vmatmul.mubr.msk.f32.vlgmr.msra.gmra.mrb[4].mxu1 %vm138_vm3, %v292_v28  ;;  %v370_v30 = vpop.permute.xlu0 %369 }
 0x186   :  { %924 = vmatpush3.xpose.msk.msra.mxu1 %vm138_vm3, %v372_v29  ;;  %925 = vmatprep.mubr.msk.f32.mxu1 %vm1031_vm2, %v1032_v5 }
 0x187   :  { %928 = vmatprep.subr.mxu1 %v1032_v5 }
 0x189   :  { %926 = vmatmul.mubr.msk.f32.vlgmr.msra.gmra.mrb[6].mxu1 %vm138_vm3, %v370_v30 }
 0x18a   :  { %930 = vmatprep.mubr.msk.f32.mxu1 %vm1031_vm2, %v1032_v5 }
 0x250   :  { %v209_v31 = vpop.f32.mrb[0].mxu1 }
 0x251   :  { %v912_v32 = vpop.f32.mrb[1].mxu1  ;;  %v447_v33 = vsel %vm138_vm3, %v209_v31, -inf }
 0x252   :  { %448 = vmax.xlane.f32.xlu1 %v447_v33 }
 0x254   :  { %v287_v34 = vpop.f32.mrb[2].mxu1 }
 0x255   :  { %v917_v35 = vpop.f32.mrb[3].mxu1  ;;  %v450_v36 = vsel %vm138_vm3, %v287_v34, -inf }
 0x256   :  { %451 = vmax.xlane.f32.xlu0 %v450_v36 }
 0x258   :  { %v365_v37 = vpop.f32.mrb[4].mxu1 }
 0x259   :  { %v922_v38 = vpop.f32.mrb[5].mxu1  ;;  %v453_v39 = vsel %vm138_vm3, %v365_v37, -inf }
 0x25a   :  { %454 = vmax.xlane.f32.xlu0 %v453_v39 }
 0x25c   :  { %v443_v40 = vpop.f32.mrb[6].mxu1 }
 0x25d   :  { %v927_v41 = vpop.f32.mrb[7].mxu1  ;;  %v456_v42 = vsel %vm138_vm3, %v443_v40, -inf }
 0x25e   :  { %457 = vmax.xlane.f32.xlu1 %v456_v42 }
 0x26f   :  { %567 = vrot.lane.b32.xlu1 %v1126_v22, %s1040_s12 }
 0x2df   :  { %v449_v43 = vpop.xlane.xlu1 %448 }
 0x2e0   :  { %v459_v44 = vsub.f32 %v209_v31, %v449_v43 }
 0x2e2   :  { %v463_v45 = vmul.f32 1.442695, %v459_v44 }
 0x2e3   :  { %v452_v46 = vpop.xlane.xlu0 %451 }
 0x2e4   :  { %990 = vpow2.f32 %v463_v45  ;;  %v460_v47 = vsub.f32 %v287_v34, %v452_v46 }
 0x2e6   :  { %v465_v48 = vmul.f32 1.442695, %v460_v47 }
 0x2e7   :  { %v455_v58 = vpop.xlane.xlu0 %454 }
 0x2e8   :  { %992 = vpow2.f32 %v465_v48  ;;  %v461_v59 = vsub.f32 %v365_v37, %v455_v58 }
 0x2ea   :  { %v467_v60 = vmul.f32 1.442695, %v461_v59 }
 0x2eb   :  { %v458_v49 = vpop.xlane.xlu1 %457 }
 0x2ec   :  { %v462_v50 = vsub.f32 %v443_v40, %v458_v49 }
 0x2ee   :  { %v991_v51 = vpop.eup %990  ;;  %v469_v52 = vmul.f32 1.442695, %v462_v50 }
 0x2ef   :  { %v471_v53 = vsel %vm138_vm3, %v991_v51, 0.0  ;;  %v568_v63 = vpop.permute.xlu1 %567 }
 0x2f0   :  { %994 = vpow2.f32 %v469_v52  ;;  %472 = vadd.xlane.f32.xlu0 %v471_v53 }
 0x2f1   :  { %996 = vpow2.f32 %v467_v60 }
 0x2f2   :  { %v993_v54 = vpop.eup %992 }
 0x2f3   :  { %v474_v55 = vsel %vm138_vm3, %v993_v54, 0.0 }
 0x2f4   :  { %475 = vadd.xlane.f32.xlu1 %v474_v55 }
 0x2fa   :  { %v995_v56 = vpop.eup %994 }
 0x2fb   :  { %v480_v57 = vsel %vm138_vm3, %v995_v56, 0.0  ;;  %v997_v61 = vpop.eup %996 }
 0x2fc   :  { %481 = vadd.xlane.f32.xlu1 %v480_v57  ;;  %v477_v62 = vsel %vm138_vm3, %v997_v61, 0.0 }
 0x306   :  { %491 = vrot.lane.b32.xlu0 %v1126_v22, %s1041_s13 }
 0x30d   :  { %643 = vrot.lane.b32.xlu1 %v1126_v22, %s1042_s14 }
 0x325   :  { %478 = vadd.xlane.f32.xlu0 %v477_v62 }
 0x33b   :  { %719 = vrot.lane.b32.xlu0 %v1126_v22, %s1043_s15 }
 0x37d   :  { %v473_v0 = vpop.xlane.xlu0 %472 }
 0x37e   :  { %998 = vrcp.f32 %v473_v0 }
 0x381   :  { %v476_v1 = vpop.xlane.xlu1 %475  ;;  %v492_v2 = vpop.permute.xlu0 %491 }
 0x382   :  { %1000 = vrcp.f32 %v476_v1  ;;  %929 = vmatpush3.msra.mxu1 %v492_v2 }
 0x383   :  { %933 = vmatprep.subr.mxu1 %v1032_v5 }
 0x388   :  { %v999_v3 = vpop.eup %998 }
 0x389   :  { %v487_v4 = vmul.f32 %v999_v3, %v991_v51  ;;  %v482_v6 = vpop.xlane.xlu1 %481 }
 0x38b   :  { %931 = vmatmul.mubr.msk.f32.vlgmr.msra.gmra.mrb[8].mxu1 %vm138_vm3, %v487_v4 }
 0x38c   :  { %v1001_v7 = vpop.eup %1000  ;;  %934 = vmatpush3.msra.mxu1 %v568_v63  ;;  %935 = vmatprep.mubr.msk.f32.mxu1 %vm1031_vm2, %v1032_v5 }
 0x38d   :  { %v488_v8 = vmul.f32 %v1001_v7, %v993_v54  ;;  %v644_v9 = vpop.permute.xlu1 %643  ;;  %938 = vmatprep.subr.mxu1 %v1032_v5 }
 0x38f   :  { %936 = vmatmul.mubr.msk.f32.vlgmr.msra.gmra.mrb[10].mxu1 %vm138_vm3, %v488_v8 }
 0x390   :  { %939 = vmatpush3.msra.mxu1 %v644_v9  ;;  %940 = vmatprep.mubr.msk.f32.mxu1 %vm1031_vm2, %v1032_v5 }
 0x391   :  { %943 = vmatprep.subr.mxu1 %v1032_v5 }
 0x3b2   :  { %v479_v10 = vpop.xlane.xlu0 %478 }
 0x3b3   :  { %1002 = vrcp.f32 %v479_v10 }
 0x3b4   :  { %1004 = vrcp.f32 %v482_v6 }
 0x3b6   :  { %v720_v14 = vpop.permute.xlu0 %719 }
 0x3bd   :  { %v1003_v11 = vpop.eup %1002 }
 0x3be   :  { %v489_v12 = vmul.f32 %v1003_v11, %v997_v61  ;;  %v1005_v13 = vpop.eup %1004 }
 0x3bf   :  { %v490_v15 = vmul.f32 %v1005_v13, %v995_v56 }
 0x3c0   :  { %941 = vmatmul.mubr.msk.f32.vlgmr.msra.gmra.mrb[12].mxu1 %vm138_vm3, %v489_v12 }
 0x3c1   :  { %944 = vmatpush3.msra.mxu1 %v720_v14  ;;  %945 = vmatprep.mubr.msk.f32.mxu1 %vm1031_vm2, %v1032_v5 }
 0x3c4   :  { %946 = vmatmul.mubr.msk.f32.vlgmr.msra.gmra.mrb[14].mxu1 %vm138_vm3, %v490_v15 }
 0x45e   :  { %v563_v16 = vpop.f32.mrb[8].mxu1 }
 0x45f   :  { %v932_v17 = vpop.f32.mrb[9].mxu1 }
 0x462   :  { %v639_v18 = vpop.f32.mrb[10].mxu1 }
 0x463   :  { %796 = vrot.lane.b32.xlu1 %v639_v18, %s1044_s16  ;;  %v937_v19 = vpop.f32.mrb[11].mxu1 }
 0x493   :  { %v715_v20 = vpop.f32.mrb[12].mxu1 }
 0x494   :  { %800 = vrot.lane.b32.xlu0 %v715_v20, %s1045_s17  ;;  %v942_v21 = vpop.f32.mrb[13].mxu1 }
 0x497   :  { %v791_v22 = vpop.f32.mrb[14].mxu1 }
 0x498   :  { %804 = vrot.lane.b32.xlu1 %v791_v22, %s1046_s18  ;;  %v947_v23 = vpop.f32.mrb[15].mxu1 }
 0x4d5   :  { %v797_v24 = vpop.permute.xlu1 %796 }
 0x4d6   :  { %v807_v25 = vsel %vm138_vm3, %v563_v16, %v797_v24 }
 0x506   :  { %v801_v5 = vpop.permute.xlu0 %800 }
 0x507   :  { %v809_v26 = vsel %vm808_vm4, %v807_v25, %v801_v5 }
 0x50a   :  { %v805_v27 = vpop.permute.xlu1 %804 }
 0x50b   :  { %v811_v28 = vsel %vm810_vm5, %v809_v26, %v805_v27 }
 0x50c   :  { %812 = vst.msk [vmem:[#allocation2] sm:$0xff] %vm25_vm0, %v811_v28 }
 0x50d   :  { %1017 = shalt.err (!%p1014_p4)
}
 0x50e   :  { %s1018_s24 = scalar_lea.hbm %s1197_s2, 128 }
 0x50f   :  { %p1019_p5 = scmp.ne.s32.totalorder %s1197_s2, %s1018_s24  ;;  %p1022_p6 = scmp.lt.u32.totalorder %s1018_s24, %s1197_s2 }
 0x511   :  { %p1024_p7 = pnand %p1022_p6, %p1019_p5 }
 0x513   :  { %1027 = shalt.err (!%p1024_p7)
}
 0x514   :  { %822 = dma.vmem_to_hbm [thread:$0]  %s820_s20, 128, %s1197_s2, [#allocation3]  }
 0x515   :  { %1028 = dma.done.wait [#allocation3], 128  }
 0x516   :  { %1029 = vsyncadd [#allocation3], 4294967168 }
 0x517   :  { %826 = vsyncpa [#allocation3], 1 }

</bundles_post_ra>
